<compile_context>
chip_gen: v6e
topology: v6e:2x2x1
jax: 0.10.0
libtpu: 0.0.40
codegen_flags: <defaults>
</compile_context>

<pallas_src>
import jax
import jax.numpy as jnp
from jax.experimental import pallas as pl
from jax.experimental.pallas import tpu as pltpu


def _round_up(x, m):
    return ((x + m - 1) // m) * m


def _make_sentiment_kernel(true_t, block_t):
    """Build the kernel with static true-T baked in (mean scale + tail mask)."""
    needs_mask = (true_t % block_t) != 0
    inv_t = 1.0 / float(true_t)          # true T, not padded-to-grid T

    def kernel(x_ref, w1_ref, b1_ref, w2_ref, b2_ref, hid_ref, acc_ref):
        t = pl.program_id(1)
        nt = pl.num_programs(1)
        tB, tT, E = x_ref.shape
        C = w1_ref.shape[1]

        @pl.when(t == 0)
        def _():
            acc_ref[...] = jnp.zeros_like(acc_ref)

        # conv1 (1x1): flattened [tB*tT, E] @ [E, C] on the MXU.  The tile
        # arrives in the producer's dtype (f32 or bf16) and is cast to bf16 on
        # the VPU here -- no wrapper-side cast round trip through HBM.
        x2d = x_ref[...].reshape(tB * tT, E).astype(jnp.bfloat16)
        h1 = jnp.dot(x2d, w1_ref[...], preferred_element_type=jnp.float32)
        h1 = jnp.maximum(h1 + b1_ref[...], 0.0)                # f32 [tB*tT, C]

        # conv2 (1x1): [tB*tT, C] @ [C, C]
        h2 = jnp.dot(h1.astype(jnp.bfloat16), w2_ref[...],
                     preferred_element_type=jnp.float32)
        h2 = jnp.maximum(h2 + b2_ref[...], 0.0)                # f32 [tB*tT, C]
        h2 = h2.reshape(tB, tT, C)

        # Running sum over time; the 1/T mean scale is applied once at the end.
        if needs_mask:
            # Mask only the last (partial / padded) time tile; the
            # iota/compare/select stays off the hot loop.
            @pl.when(t < nt - 1)
            def _():
                acc_ref[...] += jnp.sum(h2, axis=1)

            @pl.when(t == nt - 1)
            def _():
                t_idx = t * tT + jax.lax.broadcasted_iota(jnp.int32, (1, tT, C), 1)
                acc_ref[...] += jnp.sum(jnp.where(t_idx < true_t, h2, 0.0), axis=1)
        else:
            acc_ref[...] += jnp.sum(h2, axis=1)

        @pl.when(t == nt - 1)
        def _():
            hid_ref[...] = acc_ref[...] * inv_t                # mean over true T

    return kernel


def wav2vec_gru_sentiment_forward(embedded, w1, b1, w2, b2, wo, bo,
                                  *, block_t=None, block_b=None):
    """embedded: [B, T, E] = sum of wav2vec hidden states (f32 or bf16).

    Returns (output [B, out_dim], hidden [B, 128]).

    Weights use PyTorch Conv1d/Linear conventions (k=1 squeezed):
      w1:[128,E] b1:[128] w2:[128,128] b2:[128] wo:[out_dim,128] bo:[out_dim]
    """
    B, T, E = embedded.shape
    C = w1.shape[0]                                  # 128
    x_itemsize = jnp.dtype(embedded.dtype).itemsize

    # --- batch tile --------------------------------------------------------
    # Give the 'parallel' batch axis >= 2 programs when B allows it so both
    # v7x TensorCores get work (neutral on single-TC v5e/v6e).
    if block_b is None:
        if B >= 16 and (B // 2) % 8 == 0:
            block_b = B // 2
        else:
            block_b = B
    assert B % block_b == 0
    assert block_b == B or block_b % 8 == 0
    n_b = B // block_b

    # --- time tile ---------------------------------------------------------
    # Large tiles (up to 512 rows) approach the HBM roofline and amortize the
    # ~0.35us per-grid-step overhead; MXU M = block_b*block_t stays large.
    if block_t is None:
        block_t = T if T <= 512 else 512
    if block_b > 1 and block_t % 8 != 0:
        # Keep the in-kernel (tB,tT,E)->(tB*tT,E) flatten a free layout view.
        block_t = _round_up(block_t, 8)

    # --- VMEM budget (v7x: 64 MiB per TensorCore; v5e/v6e: 128 MiB) ----------
    try:
        vmem_cap = int(pltpu.get_tpu_info().vmem_capacity_bytes)
    except Exception:  # info query unavailable -> conservative per-TC default
        vmem_cap = 64 * 1024 * 1024
    vmem_budget = max(vmem_cap - 16 * 1024 * 1024, 32 * 1024 * 1024)

    def tile_bytes(bt):
        return (2 * block_b * bt * E * x_itemsize      # streamed x tile (2-buffered)
                + 2 * (E * C + C * C) * 2              # resident bf16 weights
                + 2 * 2 * C * 4                        # biases
                + 2 * block_b * bt * C * 4             # h1/h2 f32 intermediates
                + block_b * C * 4                      # accumulator scratch
                + 2 * block_b * C * 4)                 # hidden output block

    while tile_bytes(block_t) > vmem_budget and block_t > 8:
        block_t = max(8, block_t // 2)

    # --- pad time axis only if one tile must cover more than T (tiny-T case) --
    x = embedded
    t_arr = T
    if block_t > t_arr:
        x = jnp.pad(x, ((0, 0), (0, block_t - t_arr), (0, 0)))
        t_arr = block_t
    n_t = pl.cdiv(t_arr, block_t)

    # --- resident weights / biases (one-time layout prep, (K,N) order) -------
    # NOTE: real wav2vec E (768/1024) is already lane-aligned; for other E pad
    # to a multiple of 128 here if the DMA/MXU K-padding ever matters.
    w1_t = jnp.transpose(w1).astype(jnp.bfloat16)              # [E, C]
    w2_t = jnp.transpose(w2).astype(jnp.bfloat16)              # [C, C]
    b1_r = b1.reshape(1, C).astype(jnp.float32)
    b2_r = b2.reshape(1, C).astype(jnp.float32)
    # TODO(synk): on v7x the x/w1 stream could drop to fp8 (e4m3) for another
    # ~2x DMA saving; left at bf16 pending accuracy validation.

    flops = 2 * B * T * E * C + 2 * B * T * C * C
    bytes_accessed = (B * T * E * x_itemsize + (E * C + C * C) * 2
                      + 2 * C * 4 + B * C * 4)
    vmem_limit = int(min(max(2 * tile_bytes(block_t), 32 * 1024 * 1024),
                         vmem_budget))

    kernel = _make_sentiment_kernel(T, block_t)

    hidden = pl.pallas_call(
        kernel,
        out_shape=jax.ShapeDtypeStruct((B, C), jnp.float32),
        grid_spec=pltpu.PrefetchScalarGridSpec(
            num_scalar_prefetch=0,
            grid=(n_b, n_t),                       # reduction (time) axis last
            in_specs=[
                pl.BlockSpec((block_b, block_t, E), lambda b, t: (b, t, 0)),
                # NOTE(v7x): these constant-index residents could take
                # pipeline_mode=pl.Buffered(1) to reclaim ~0.3 MiB of VMEM.
                pl.BlockSpec((E, C), lambda b, t: (0, 0)),     # w1 (resident)
                pl.BlockSpec((1, C), lambda b, t: (0, 0)),     # b1
                pl.BlockSpec((C, C), lambda b, t: (0, 0)),     # w2 (resident)
                pl.BlockSpec((1, C), lambda b, t: (0, 0)),     # b2
            ],
            out_specs=pl.BlockSpec((block_b, C), lambda b, t: (b, 0)),
            scratch_shapes=[pltpu.VMEM((block_b, C), jnp.float32)],
        ),
        compiler_params=pltpu.CompilerParams(
            dimension_semantics=("parallel", "arbitrary"),
            vmem_limit_bytes=vmem_limit,
        ),
        cost_estimate=pl.CostEstimate(flops=flops, transcendentals=0,
                                      bytes_accessed=bytes_accessed),
    )(x, w1_t, b1_r, w2_t, b2_r)

    # Final linear (128 -> out_dim, out_dim ~ 3): tiny, lane-sparse, once per
    # row -- cheaper as a plain XLA op on the returned hidden than as a
    # ~97%-padded MXU call plus masked partial stores inside the kernel.
    out = hidden @ jnp.transpose(wo).astype(jnp.float32) + bo.astype(jnp.float32)[None, :]
    return out, hidden


def reference_forward(embedded, w1, b1, w2, b2, wo, bo):
    # Pure-JAX f32 reference mirroring the PyTorch forward exactly.
    h1 = jnp.maximum(jnp.einsum('bte,ce->btc', embedded, w1) + b1[None, None, :], 0.0)
    h2 = jnp.maximum(jnp.einsum('btc,dc->btd', h1, w2) + b2[None, None, :], 0.0)
    hidden = jnp.mean(h2, axis=1)
    out = hidden @ wo.T + bo[None, :]
    return out, hidden


if __name__ == "__main__":
    key = jax.random.PRNGKey(0)
    B, T, E = 2, 16, 32          # batch, wav2vec frames, wav2vec hidden_size
    C = 128                      # conv channels (fixed by the module)
    OUT_DIM = 3                  # sentiment classes
    N_LAYERS = 4                 # synthetic wav2vec hidden_states layers

    keys = jax.random.split(key, 8)

    # Synthetic wav2vec hidden_states and their sum (glue, not kernel work).
    # TODO(synk): the actual pretrained wav2vec transformer is not reproduced.
    # Perf note: if the real producer emits the layer-sum directly in bf16
    # (fused sum+cast), pass that bf16 array straight in -- the kernel streams
    # whatever dtype it receives and casts in-VMEM.
    hidden_all = jax.random.normal(keys[0], (N_LAYERS, B, T, E), jnp.float32)
    embedded = jnp.sum(hidden_all, axis=0)           # [B, T, E], f32

    # Deterministic parameters (PyTorch Conv1d/Linear shapes, k=1 squeezed).
    w1 = jax.random.normal(keys[1], (C, E), jnp.float32) * 0.05
    b1 = jax.random.normal(keys[2], (C,), jnp.float32) * 0.05
    w2 = jax.random.normal(keys[3], (C, C), jnp.float32) * 0.05
    b2 = jax.random.normal(keys[4], (C,), jnp.float32) * 0.05
    wo = jax.random.normal(keys[5], (OUT_DIM, C), jnp.float32) * 0.05
    bo = jax.random.normal(keys[6], (OUT_DIM,), jnp.float32) * 0.05

    out, hidden = wav2vec_gru_sentiment_forward(
        embedded, w1, b1, w2, b2, wo, bo, block_t=8)   # 2 time tiles -> pipelined
    out = jax.block_until_ready(out)
    hidden = jax.block_until_ready(hidden)

    ref_out, ref_hidden = reference_forward(embedded, w1, b1, w2, b2, wo, bo)
    assert out.shape == (B, OUT_DIM) and hidden.shape == (B, C)
    # bf16 matmul operands (f32 accumulate) -> loosened tolerance vs f32 reference.
    assert jnp.allclose(out, ref_out, atol=2e-2, rtol=2e-2)
    assert jnp.allclose(hidden, ref_hidden, atol=2e-2, rtol=2e-2)

    print("KERNEL_OK")
</pallas_src>

<mosaic_0001>
module attributes {stable_mosaic.version = 11 : i64} {
  func.func @kernel(%arg0: i32, %arg1: i32, %arg2: memref<2x8x32xf32, #tpu.memory_space<vmem>>, %arg3: memref<32x128xbf16, #tpu.memory_space<vmem>>, %arg4: memref<1x128xf32, #tpu.memory_space<vmem>>, %arg5: memref<128x128xbf16, #tpu.memory_space<vmem>>, %arg6: memref<1x128xf32, #tpu.memory_space<vmem>>, %arg7: memref<2x128xf32, #tpu.memory_space<vmem>>, %arg8: memref<2x128xf32, #tpu.memory_space<vmem>>) attributes {dimension_semantics = [#tpu.dimension_semantics<parallel>, #tpu.dimension_semantics<arbitrary>], iteration_bounds = array<i64: 1, 2>, scalar_prefetch = 0 : i64, scratch_operands = 1 : i64, tpu.core_type = #tpu.core_type<tc>, window_params = [{transform_indices = @transform_0, window_bounds = array<i64: 2, 8, 32>}, {pipeline_mode = #tpu.pipeline_mode<synchronous>, transform_indices = @transform_1, window_bounds = array<i64: 32, 128>}, {pipeline_mode = #tpu.pipeline_mode<synchronous>, transform_indices = @transform_2, window_bounds = array<i64: 1, 128>}, {pipeline_mode = #tpu.pipeline_mode<synchronous>, transform_indices = @transform_3, window_bounds = array<i64: 128, 128>}, {pipeline_mode = #tpu.pipeline_mode<synchronous>, transform_indices = @transform_4, window_bounds = array<i64: 1, 128>}, {transform_indices = @transform_5, window_bounds = array<i64: 2, 128>}]} {
    %c0_i32 = arith.constant 0 : i32
    %0 = arith.cmpi eq, %arg1, %c0_i32 : i32
    %1 = arith.extui %0 : i1 to i32
    %c0_i32_0 = arith.constant 0 : i32
    %2 = arith.cmpi ne, %1, %c0_i32_0 : i32
    scf.if %2 {
      %cst_20 = arith.constant 0.000000e+00 : f32
      %29 = vector.broadcast %cst_20 : f32 to vector<2x128xf32>
      %c0_21 = arith.constant 0 : index
      %c0_22 = arith.constant 0 : index
      %30 = vector.load %arg8[%c0_21, %c0_22] : memref<2x128xf32, #tpu.memory_space<vmem>>, vector<2x128xf32>
      tpu.vector_store %arg8[%c0_21, %c0_22], %29 {strides = array<i32>} : memref<2x128xf32, #tpu.memory_space<vmem>>, vector<2x128xf32>,
    } else {
    }
    %c0 = arith.constant 0 : index
    %c0_1 = arith.constant 0 : index
    %c0_2 = arith.constant 0 : index
    %3 = vector.load %arg2[%c0, %c0_1, %c0_2] : memref<2x8x32xf32, #tpu.memory_space<vmem>>, vector<2x8x32xf32>
    %4 = vector.shape_cast %3 : vector<2x8x32xf32> to vector<16x32xf32>
    %5 = arith.truncf %4 : vector<16x32xf32> to vector<16x32xbf16>
    %c0_3 = arith.constant 0 : index
    %c0_4 = arith.constant 0 : index
    %6 = vector.load %arg3[%c0_3, %c0_4] : memref<32x128xbf16, #tpu.memory_space<vmem>>, vector<32x128xbf16>
    %cst = arith.constant dense<0.000000e+00> : vector<16x128xf32>
    %7 = tpu.matmul %5, %6, %cst {dimension_numbers = #tpu.dot_dimension_numbers<[1], [0], [0], [1], [0, 0, 1, 1], [], []>} : vector<16x32xbf16>, vector<32x128xbf16>, vector<16x128xf32> -> vector<16x128xf32>
    %c0_5 = arith.constant 0 : index
    %c0_6 = arith.constant 0 : index
    %8 = vector.load %arg4[%c0_5, %c0_6] : memref<1x128xf32, #tpu.memory_space<vmem>>, vector<1x128xf32>
    %9 = vector.broadcast %8 : vector<1x128xf32> to vector<16x128xf32>
    %10 = arith.addf %7, %9 : vector<16x128xf32>
    %cst_7 = arith.constant 0.000000e+00 : f32
    %11 = vector.broadcast %cst_7 : f32 to vector<16x128xf32>
    %12 = arith.maximumf %10, %11 : vector<16x128xf32>
    %13 = arith.truncf %12 : vector<16x128xf32> to vector<16x128xbf16>
    %c0_8 = arith.constant 0 : index
    %c0_9 = arith.constant 0 : index
    %14 = vector.load %arg5[%c0_8, %c0_9] : memref<128x128xbf16, #tpu.memory_space<vmem>>, vector<128x128xbf16>
    %cst_10 = arith.constant dense<0.000000e+00> : vector<16x128xf32>
    %15 = tpu.matmul %13, %14, %cst_10 {dimension_numbers = #tpu.dot_dimension_numbers<[1], [0], [0], [1], [0, 0, 1, 1], [], []>} : vector<16x128xbf16>, vector<128x128xbf16>, vector<16x128xf32> -> vector<16x128xf32>
    %c0_11 = arith.constant 0 : index
    %c0_12 = arith.constant 0 : index
    %16 = vector.load %arg6[%c0_11, %c0_12] : memref<1x128xf32, #tpu.memory_space<vmem>>, vector<1x128xf32>
    %17 = vector.broadcast %16 : vector<1x128xf32> to vector<16x128xf32>
    %18 = arith.addf %15, %17 : vector<16x128xf32>
    %cst_13 = arith.constant 0.000000e+00 : f32
    %19 = vector.broadcast %cst_13 : f32 to vector<16x128xf32>
    %20 = arith.maximumf %18, %19 : vector<16x128xf32>
    %21 = vector.shape_cast %20 : vector<16x128xf32> to vector<2x8x128xf32>
    %c0_14 = arith.constant 0 : index
    %c0_15 = arith.constant 0 : index
    %22 = vector.load %arg8[%c0_14, %c0_15] : memref<2x128xf32, #tpu.memory_space<vmem>>, vector<2x128xf32>
    %cst_16 = arith.constant dense<0.000000e+00> : vector<2x128xf32>
    %23 = vector.multi_reduction <add>, %21, %cst_16 [1] : vector<2x8x128xf32> to vector<2x128xf32>
    %24 = arith.addf %22, %23 : vector<2x128xf32>
    %c0_17 = arith.constant 0 : index
    %c0_18 = arith.constant 0 : index
    %25 = vector.load %arg8[%c0_17, %c0_18] : memref<2x128xf32, #tpu.memory_space<vmem>>, vector<2x128xf32>
    tpu.vector_store %arg8[%c0_17, %c0_18], %24 {strides = array<i32>} : memref<2x128xf32, #tpu.memory_space<vmem>>, vector<2x128xf32>,
    %c1_i32 = arith.constant 1 : i32
    %26 = arith.cmpi eq, %arg1, %c1_i32 : i32
    %27 = arith.extui %26 : i1 to i32
    %c0_i32_19 = arith.constant 0 : i32
    %28 = arith.cmpi ne, %27, %c0_i32_19 : i32
    scf.if %28 {
      %c0_20 = arith.constant 0 : index
      %c0_21 = arith.constant 0 : index
      %29 = vector.load %arg8[%c0_20, %c0_21] : memref<2x128xf32, #tpu.memory_space<vmem>>, vector<2x128xf32>
      %cst_22 = arith.constant 6.250000e-02 : f32
      %30 = vector.broadcast %cst_22 : f32 to vector<2x128xf32>
      %31 = arith.mulf %29, %30 : vector<2x128xf32>
      %c0_23 = arith.constant 0 : index
      %c0_24 = arith.constant 0 : index
      %32 = vector.load %arg7[%c0_23, %c0_24] : memref<2x128xf32, #tpu.memory_space<vmem>>, vector<2x128xf32>
      tpu.vector_store %arg7[%c0_23, %c0_24], %31 {strides = array<i32>} : memref<2x128xf32, #tpu.memory_space<vmem>>, vector<2x128xf32>,
    } else {
    }
    return
  }
  func.func @transform_0(%arg0: i32, %arg1: i32) -> (i32, i32, i32) {
    %c0_i32 = arith.constant 0 : i32
    %c0_i32_0 = arith.constant 0 : i32
    return %arg0, %arg1, %c0_i32 : i32, i32, i32
  }
  func.func @transform_1(%arg0: i32, %arg1: i32) -> (i32, i32) {
    %c0_i32 = arith.constant 0 : i32
    %c0_i32_0 = arith.constant 0 : i32
    %c0_i32_1 = arith.constant 0 : i32
    return %c0_i32, %c0_i32_0 : i32, i32
  }
  func.func @transform_2(%arg0: i32, %arg1: i32) -> (i32, i32) {
    %c0_i32 = arith.constant 0 : i32
    %c0_i32_0 = arith.constant 0 : i32
    %c0_i32_1 = arith.constant 0 : i32
    return %c0_i32, %c0_i32_0 : i32, i32
  }
  func.func @transform_3(%arg0: i32, %arg1: i32) -> (i32, i32) {
    %c0_i32 = arith.constant 0 : i32
    %c0_i32_0 = arith.constant 0 : i32
    %c0_i32_1 = arith.constant 0 : i32
    return %c0_i32, %c0_i32_0 : i32, i32
  }
  func.func @transform_4(%arg0: i32, %arg1: i32) -> (i32, i32) {
    %c0_i32 = arith.constant 0 : i32
    %c0_i32_0 = arith.constant 0 : i32
    %c0_i32_1 = arith.constant 0 : i32
    return %c0_i32, %c0_i32_0 : i32, i32
  }
  func.func @transform_5(%arg0: i32, %arg1: i32) -> (i32, i32) {
    %c0_i32 = arith.constant 0 : i32
    %c0_i32_0 = arith.constant 0 : i32
    return %arg0, %c0_i32 : i32, i32
  }
}

</mosaic_0001>

<bundles_post_ra>
// kernel: tpu_custom_call.1
= control target key start
LH: loop header
LB: loop body
LE: loop exit
PB: predicated region body
PF: predicated region fallthrough
CT: control target
= control target key end

     0   :  { %s1125_s0 = inlined_call_operand.hbm [shape: f32[2,16,32], index: 0, kind: input, shape index: {}]   ;;  %s1126_s1 = inlined_call_operand.hbm [shape: bf16[32,128], index: 1, kind: input, shape index: {}]   ;;  %s1127_s2 = inlined_call_operand.vmem [shape: f32[1,128], index: 2, kind: input, shape index: {}]   ;;  %s1128_s3 = inlined_call_operand.hbm [shape: bf16[128,128], index: 3, kind: input, shape index: {}]   ;;  %s1129_s4 = inlined_call_operand.vmem [shape: f32[1,128], index: 4, kind: input, shape index: {}]   ;;  %s1130_s5 = inlined_call_operand.hbm [shape: f32[2,128], index: 5, kind: output, shape index: {}]  }
   0x1   :  { %1134 = sst [smem:[#allocation13_spill]] %s1126_s1 }
   0x2   :  { %10 = vsyncpa [#allocation4], 0 }
   0x3   :  { %12 = vsyncpa [#allocation4 + $0x1], 0 }
   0x4   :  { %13 = vsyncpa [#allocation7], 0 }
   0x5   :  { %14 = vsyncpa [#allocation5], 0  ;;  %s971_s18 = smov 0   ;;  %s973_s19 = smov 0  }
   0x6   :  { %s975_s20 = smov 0   ;;  %s977_s21 = smov 0  }
   0x7   :  { %s979_s22 = smov 0   ;;  %s981_s23 = smov 0  }
   0x8 LB: > { %s1133_s24 = sadd.s32 4294967295, %s927_s23   ;;  %p48_p0 = scmp.ne.s32.totalorder %s915_s20, %s911_s19  ;;  %s927_s23 = sphi %s981_s23, %s20_s23   ;;  %s923_s22 = sphi %s979_s22, %s1148_s22   ;;  %s919_s21 = sphi %s977_s21, %s1147_s21   ;;  %s915_s20 = sphi %s975_s20, %s1146_s20   ;;  %s911_s19 = sphi %s973_s19, %s1145_s19   ;;  %s907_s18 = sphi %s971_s18, %s1144_s18  }
   0x9   : > { %p49_p1 = scmp.eq.s32.totalorder %s927_s23, 0  ;;  %p54_p2 = scmp.ne.s32.totalorder %s911_s19, %s907_s18 }
   0xa   : > { %p1006_p3 = scmp.eq.s32.totalorder %s1133_s24, 0  ;;  %p595_p4 = scmp.ge.s32.totalorder %s927_s23, 1 }
   0xb   : > { %p50_p5 = por %p49_p1, %p48_p0  ;;  %p175_p6 = scmp.lt.s32.totalorder %s927_s23, 3 }
   0xc   : > { %s1135_s25 = scalar_select %p1006_p3, 1, 0 }
   0xd   : > { %p1014_p7 = por %p1006_p3, %p54_p2  ;;  %p1018_p8 = pnand %p595_p4, %p175_p6 }
   0xe   : > { %s929_s28 = smov [#allocation6]   ;;  %p691_p11 = scmp.lt.s32.totalorder %s927_s23, 2 }
   0xf   : > { %s187_s29 = sshll.u32 %s929_s28, 4  ;;  %p678_p9 = pneg %p1018_p8  ;;  %s188_s29 = int_to_ptr.vmem [resolvable:$true] %s187_s29 }
  0x10   : > { %p1031_p12 = pnand %p691_p11, %p50_p5  ;;  %s776_s7 = scalar_lea.vmem %s188_s29, 256 }
  0x11   : > { %p1026_p10 = pnand %p678_p9, %p1006_p3  ;;  %p777_p0 = scmp.ne.s32.totalorder %s188_s29, %s776_s7 }
  0x12   : > { %p784_p4 = scmp.lt.s32.totalorder %s188_s29, %s188_s29  ;;  %p785_p6 = scmp.lt.s32.totalorder %s776_s7, %s776_s7 }
  0x13   : > { %p767_p13 = pneg %p1026_p10 }
  0x14   : > { %p786_p9 = por %p785_p6, %p784_p4 }
  0x15   : > { %p779_p1 = pnand %p777_p0, %p767_p13 }
  0x17   : > { %p780_p2 = pneg %p779_p1 }
  0x19   : > { %p787_p3 = pnand %p786_p9, %p780_p2 }
  0x1b   : > { %790 = shalt.err (!%p787_p3)
}
  0x1c   : > { %s930_s8 = smov 64   ;;  %s931_s9 = smov 4  }
  0x1d   : > { %s1140_s1 = sld [smem:[#allocation13_spill]]  ;;  %s932_s12 = smov [#allocation8]  }
  0x1e   : > { %s203_s13 = sshll.u32 %s932_s12, 4  ;;  %s204_s13 = int_to_ptr.vmem [resolvable:$true] %s203_s13 }
  0x1f   : > { %s802_s14 = scalar_lea.vmem %s204_s13, 1024  ;;  %p810_p1 = scmp.lt.s32.totalorder %s204_s13, %s204_s13 }
  0x20   : > { %p803_p5 = scmp.ne.s32.totalorder %s204_s13, %s802_s14  ;;  %p811_p3 = scmp.lt.s32.totalorder %s802_s14, %s802_s14 }
  0x22   : > { %p805_p11 = pnand %p803_p5, %p767_p13  ;;  %p812_p2 = por %p811_p3, %p810_p1 }
  0x23   : > { %681 = dma.hbm_to_vmem [thread:$0]  (!%p1026_p10), %s1140_s1, 256, %s188_s29, [#allocation7], %s930_s8, %s930_s8, %s931_s9  }
  0x24   : > { %p806_p0 = pneg %p805_p11 }
  0x26   : > { %p813_p4 = pnand %p812_p2, %p806_p0 }
  0x28   : > { %816 = shalt.err (!%p813_p4)
}
  0x29   : > { %684 = dma.hbm_to_vmem [thread:$0]  (!%p1026_p10), %s1128_s3, 1024, %s204_s13, [#allocation7], %s930_s8, %s930_s8, %s931_s9  }
  0x2a   : > { %s29_s17 = sadd.s32 1, %s923_s22  ;;  %s41_s18 = sadd.s32 1, %s915_s20 }
  0x2b   : > { %p30_p13 = scmp.ge.s32.totalorder %s29_s17, 2  ;;  %s220_s28 = sand.u32 1, %s915_s20  }
  0x2c   : > { %s599_s29 = sshll.u32 %s220_s28, 4  ;;  %s600_s30 = sshll.u32 %s923_s22, 7 }
  0x2d   : > { %s1150_s17 = smov (%p30_p13, %s29_s17), 0  ;;  %s232_s12 = scalar_lea.hbm %s1125_s0, %s600_s30 }
  0x2e   : > { %s37_s7 = ssub.s32 %s923_s22, %s1150_s17  ;;  %s224_s14 = scalar_lea.vmem [#allocation3], %s599_s29 }
  0x2f   : > { %p39_p6 = scmp.eq.s32.totalorder %s37_s7, 0  ;;  %s233_s15 = sshll.u32 %s224_s14, 4  ;;  %s234_s15 = int_to_ptr.vmem [resolvable:$true] %s233_s15 }
  0x30   : > { %s221_s9 = scalar_lea.sflag [#allocation4], %s220_s28  ;;  %p819_p10 = pneg %p1031_p12 }
  0x31   : > { %s1065_s8 = scalar_select %p39_p6, %s915_s20, %s41_s18  }
  0x32   : > { %s830_s13 = scalar_lea.vmem %s234_s15, 256  ;;  %s933_s16 = smov [#allocation3]  }
  0x33   : > { %p831_p9 = scmp.ne.s32.totalorder %s234_s15, %s830_s13  ;;  %s835_s24 = sshll.u32 %s933_s16, 4  ;;  %s836_s24 = int_to_ptr.vmem [resolvable:$false] %s835_s24 }
  0x34   : > { %s837_s1 = scalar_lea.vmem %s836_s24, 512  ;;  %p838_p0 = scmp.lt.s32.totalorder %s234_s15, %s836_s24 }
  0x35   : > { %p833_p5 = pnand %p831_p9, %p819_p10  ;;  %p839_p1 = scmp.lt.s32.totalorder %s837_s1, %s830_s13 }
  0x37   : > { %p834_p11 = pneg %p833_p5  ;;  %p840_p3 = por %p839_p1, %p838_p0 }
  0x39   : > { %p841_p2 = pnand %p840_p3, %p834_p11 }
  0x3b   : > { %844 = shalt.err (!%p841_p2)
}
  0x3c   : > { %s934_s29 = smov 256   ;;  %s935_s18 = smov 128  }
  0x3d   : > { %s936_s30 = smov 8   ;;  %245 = sbr.rel (%p1018_p8) target bundleno = 533 (0x215), region = 40 }
  0x3e   : > { %688 = dma.hbm_to_vmem [thread:$0]  (!%p1031_p12), %s232_s12, 256, %s234_s15, %s221_s9, %s934_s29, %s935_s18, %s936_s30  }
  0x3f   : > { %s247_s28 = sand.u32 (!%p1018_p8), 1, %s911_s19  }
  0x40   : > { %s602_s7 = sshll.u32 (!%p1018_p8), %s247_s28, 4  ;;  %s248_s10 = scalar_lea.sflag (!%p1018_p8), [#allocation4], %s247_s28 }
  0x41   : > { %s251_s11 = scalar_lea.vmem (!%p1018_p8), [#allocation3], %s602_s7 }
  0x42   : > { %894 = dma.done.wait (%p1014_p7), %s248_s10, 256  }
  0x43   : > { %896 = vsyncadd (%p1014_p7), %s248_s10, 4294967040  ;;  %p1141_p4 = scmp.ne.s32.totalorder %s1135_s25, 0 }
  0x45   : > { %898 = dma.done.wait (%p1141_p4), [#allocation7], 1280  }
  0x46   : > { %900 = vsyncadd (%p1141_p4), [#allocation7], 4294966016  ;;  %p605_p12 = scmp.ne.s32.totalorder %s919_s21, 0 }
  0x48   : > { %286 = sbr.rel (%p605_p12) target bundleno = 79 (0x4f), region = 56 }
  0x4d   : > { %v937_v0 = vmov 0.0  }
  0x4e   : > { %287 = vst [vmem:[#allocation2] sm:$0x3] %v937_v0 }
  0x4f PF: > { %v755_v1 = vld [vmem:[#allocation6 + $0x8] sm:$0xff]   ;;  %v938_v2 = vmov 0.0   ;;  %v756_v3 = vld [vmem:[#allocation6] sm:$0xff]   ;;  %vm939_vm0 = vmmov 0   ;;  %vm314_vm1 = vcmask 261120   ;;  %v759_v9 = vld [vmem:[#allocation8 + $0x28] sm:$0xff]  }
  0x50   : > { %636 = vmatprep.subr.bf16.mxu0 %v938_v2  ;;  %644 = vmatprep.subr.bf16.mxu1 %v938_v2  ;;  %v288_v4 = vld [vmem:[%s251_s11] sm:$0xff]  ;;  %v289_v5 = vld [vmem:[%s251_s11 + $0x8] sm:$0xff]  ;;  %vm491_vm2 = vcmask 1041409   ;;  %p619_p7 = scmp.ne.s32.totalorder %s919_s21, 1 }
  0x51   : > { %637 = vmatpush3.bf16.msra.mxu0 %v755_v1  ;;  %640 = vmatprep.mubr.msk.bf16.mxu0 %vm939_vm0, %v938_v2  ;;  %v757_v6 = vld [vmem:[#allocation8 + $0x38] sm:$0xff]   ;;  %v290_v7 = vpack.c.bf16 %v289_v5, %v288_v4  ;;  %v758_v8 = vld [vmem:[#allocation8 + $0x30] sm:$0xff]   ;;  %v760_v10 = vld [vmem:[#allocation8 + $0x20] sm:$0xff]  }
  0x52   : > { %638 = vmatprep.subr.bf16.mxu0 %v938_v2  ;;  %660 = vmatprep.mubr.msk.bf16.mxu1 %vm939_vm0, %v938_v2  ;;  %v761_v11 = vld [vmem:[#allocation8 + $0x18] sm:$0xff]   ;;  %v762_v12 = vld [vmem:[#allocation8 + $0x10] sm:$0xff]   ;;  %v763_v13 = vld [vmem:[#allocation8 + $0x8] sm:$0xff]  }
  0x53   : > { %645 = vmatpush3.bf16.msra.mxu1 %v757_v6  ;;  %v764_v14 = vld [vmem:[#allocation8] sm:$0xff]   ;;  %v606_v15 = vld [vmem:[%s1127_s2] ss:$0 sm:$0xff] }
  0x54   : > { %646 = vmatprep.subr.bf16.mxu1 %v938_v2  ;;  %v610_v25 = vld [vmem:[%s1129_s4] ss:$0 sm:$0xff] }
  0x55   : > { %639 = vmatpush3.bf16.msra.mxu0 %v756_v3  ;;  %v476_v45 = vld [vmem:[#allocation2] sm:$0x3] }
  0x57   : > { %647 = vmatpush3.bf16.msra.mxu1 %v758_v8 }
  0x58   : > { %641 = vmatmul.mubr.msk.bf16.vlgmr.msra.gmra.mxu0 %vm314_vm1, %v290_v7  ;;  %648 = vmatprep.subr.bf16.mxu1 %v938_v2 }
  0x5b   : > { %649 = vmatpush3.bf16.msra.mxu1 %v759_v9 }
  0x5c   : > { %650 = vmatprep.subr.bf16.mxu1 %v938_v2 }
  0x5f   : > { %651 = vmatpush3.bf16.msra.mxu1 %v760_v10 }
  0x60   : > { %652 = vmatprep.subr.bf16.mxu1 %v938_v2 }
  0x63   : > { %653 = vmatpush3.bf16.msra.mxu1 %v761_v11 }
  0x64   : > { %654 = vmatprep.subr.bf16.mxu1 %v938_v2 }
  0x67   : > { %655 = vmatpush3.bf16.msra.mxu1 %v762_v12 }
  0x68   : > { %656 = vmatprep.subr.bf16.mxu1 %v938_v2 }
  0x6b   : > { %657 = vmatpush3.bf16.msra.mxu1 %v763_v13 }
  0x6c   : > { %658 = vmatprep.subr.bf16.mxu1 %v938_v2 }
  0x6f   : > { %659 = vmatpush3.bf16.msra.mxu1 %v764_v14 }
 0x118   : > { %v352_v16 = vpop.f32.mrf.mxu0 }
 0x119   : > { %v353_v18 = vadd.f32 %v606_v15, %v352_v16 }
 0x11a   : > { %v642_v17 = vpop.f32.mrf.mxu0 }
 0x11b   : > { %v359_v22 = vmax.f32 %v353_v18, 0.0 }
 0x11c   : > { %v355_v19 = vpop.f32.mrf.mxu0 }
 0x11d   : > { %v356_v20 = vadd.f32 %v606_v15, %v355_v19 }
 0x11e   : > { %v643_v21 = vpop.f32.mrf.mxu0 }
 0x11f   : > { %v360_v23 = vmax.f32 %v356_v20, 0.0 }
 0x121   : > { %v361_v24 = vpack.c.bf16 %v360_v23, %v359_v22 }
 0x123   : > { %661 = vmatmul.mubr.bf16.vlgmr.msra.gmra.mxu1 %v361_v24 }
 0x1e3   : > { %v467_v26 = vpop.f32.mrf.mxu1 }
 0x1e4   : > { %v468_v27 = vadd.f32 %v610_v25, %v467_v26 }
 0x1e5   : > { %v662_v28 = vpop.f32.mrf.mxu1 }
 0x1e6   : > { %v474_v29 = vmax.f32 %v468_v27, 0.0 }
 0x1e7   : > { %v470_v30 = vpop.f32.mrf.mxu1 }
 0x1e8   : > { %v477_v31 = vrot.slane %v474_v29, 4  ;;  %v471_v32 = vadd.f32 %v610_v25, %v470_v30 }
 0x1e9   : > { %v663_v33 = vpop.f32.mrf.mxu1 }
 0x1ea   : > { %v478_v34 = vadd.f32 %v477_v31, %v474_v29  ;;  %v475_v35 = vmax.f32 %v471_v32, 0.0 }
 0x1ec   : > { %v479_v36 = vrot.slane %v478_v34, 2  ;;  %v483_v37 = vrot.slane %v475_v35, 4 }
 0x1ee   : > { %v480_v38 = vadd.f32 %v479_v36, %v478_v34  ;;  %v484_v39 = vadd.f32 %v483_v37, %v475_v35 }
 0x1f0   : > { %v485_v40 = vrot.slane %v484_v39, 2  ;;  %v481_v41 = vrot.slane %v480_v38, 1 }
 0x1f2   : > { %v486_v42 = vadd.f32 %v485_v40, %v484_v39  ;;  %v482_v44 = vadd.f32 %v481_v41, %v480_v38 }
 0x1f4   : > { %v487_v43 = vrot.slane %v486_v42, 1 }
 0x1f6   : > { %v488_v46 = vadd.f32 %v487_v43, %v486_v42 }
 0x1f7   : > { %499 = sbr.rel (%p619_p7) target bundleno = 518 (0x206), region = 60 }
 0x1f8   : > { %v492_v47 = vsel %vm491_vm2, %v488_v46, %v482_v44 }
 0x1f9   : > { %v494_v48 = vadd.f32 %v492_v47, %v476_v45 }
 0x1fb   : > { %495 = vst [vmem:[#allocation2] sm:$0x3] %v494_v48 }
 0x202   : > { %v500_v49 = vld [vmem:[#allocation2] sm:$0x3] }
 0x203   : > { %v501_v50 = vmul.f32 0.0625, %v500_v49 }
 0x205   : > { %502 = vst [vmem:[#allocation9] sm:$0x3] %v501_v50 }
 0x206 PF: > { %s1142_s27 = sadd.s32 4294967295, %s927_s23   ;;  %s940_s12 = smov [#allocation9]  }
 0x207   : > { %p1092_p8 = scmp.eq.s32.totalorder %s1142_s27, 1  ;;  %s512_s14 = sshll.u32 %s940_s12, 4  ;;  %s513_s14 = int_to_ptr.vmem [resolvable:$true] %s512_s14 }
 0x208   : > { %s845_s15 = scalar_lea.vmem %s513_s14, 32  ;;  %p852_p9 = scmp.lt.s32.totalorder %s513_s14, %s513_s14 }
 0x209   : > { %p846_p13 = scmp.ne.s32.totalorder %s513_s14, %s845_s15  ;;  %p853_p5 = scmp.lt.s32.totalorder %s845_s15, %s845_s15 }
 0x20b   : > { %p847_p6 = pnand %p846_p13, %p1092_p8  ;;  %p854_p11 = por %p853_p5, %p852_p9 }
 0x20d   : > { %p848_p10 = pneg %p847_p6 }
 0x20f   : > { %p855_p0 = pnand %p854_p11, %p848_p10 }
 0x211   : > { %858 = shalt.err (!%p855_p0)
}
 0x212   : > { %675 = dma.vmem_to_hbm [thread:$0]  (%p1092_p8), %s513_s14, 32, %s1130_s5, [#allocation5]  }
 0x213   : > { %902 = dma.done.wait (%p1092_p8), [#allocation5], 32  }
 0x214   : > { %904 = vsyncadd (%p1092_p8), [#allocation5], 4294967264 }
 0x215 PF: > { %s20_s23 = sadd.s32 1, %s927_s23   ;;  %s1144_s18 = smov %s911_s19 }
 0x216   : > { %p17_p1 = scmp.ge.s32.totalorder %s20_s23, 4   ;;  %s1145_s19 = smov %s915_s20 }
 0x217   : > { %s1146_s20 = smov %s1065_s8  ;;  %s1147_s21 = smov %s923_s22 }
 0x218   : > { %s1148_s22 = smov %s1150_s17  ;;  %19 = sbr.rel (!%p17_p1) target bundleno = 8 (0x8), region = 94 }
 0x21d   :  { %525 = vsyncpa [#allocation4], 1 }
 0x21e   :  { %527 = vsyncpa [#allocation4 + $0x1], 1 }
 0x21f   :  { %528 = vsyncpa [#allocation7], 1 }
 0x220   :  { %529 = vsyncpa [#allocation5], 1 }
 0x221   :  { %531 = vsyncpa [#allocation5 + $0x1], 1 }

</bundles_post_ra>
